<compile_context>
chip_gen: v7x
topology: tpu7x:2x2x1
jax: 0.10.0
libtpu: 0.0.40
codegen_flags: <defaults>
</compile_context>

<pallas_src>
import jax
import jax.numpy as jnp
from jax.experimental import pallas as pl
from jax.experimental.pallas import tpu as pltpu


def _round_up(n, m):
    return ((n + m - 1) // m) * m


def _cdiv(a, b):
    return (a + b - 1) // b


def _mlp_kernel(x_ref, w1_ref, b1_ref, w2_ref, b2_ref, o_ref):
    # One batch tile per grid step: linear -> relu -> linear, fused in VMEM.
    x = x_ref[...]
    h = jnp.dot(x, w1_ref[...], preferred_element_type=jnp.float32)
    h = jnp.maximum(h + b1_ref[...], 0.0)                      # F.relu(linear(x)), f32
    y = jnp.dot(h.astype(w2_ref.dtype), w2_ref[...],
                preferred_element_type=jnp.float32) + b2_ref[...]
    o_ref[...] = y.astype(o_ref.dtype)


def prepare_params(w1, b1, w2, b2, *, compute_dtype=jnp.bfloat16):
    """One-time, out-of-hot-path param prep: cast weights to the MXU compute
    dtype; biases stay f32 (bias add + relu run in f32 on all generations)."""
    cdt = compute_dtype
    return (w1.astype(cdt),
            b1.astype(jnp.float32).reshape(1, -1),
            w2.astype(cdt),
            b2.astype(jnp.float32).reshape(1, -1))


def neural_network_forward(x, w1, b1, w2, b2, *, block_b=2048):
    """Forward pass of NeuralNetwork: relu(x @ w1 + b1) @ w2 + b2.

    x : [B, input_size]
    w1: [input_size, hidden_size]   (transposed PyTorch linear.weight), compute dtype
    b1: [1, hidden_size]            float32
    w2: [hidden_size, output_size]  (transposed PyTorch linear2.weight), compute dtype
    b2: [1, output_size]            float32
    returns [B, output_size] float32
    """
    B, in_size = x.shape
    in_w, hidden = w1.shape
    hid_w, out_size = w2.shape
    assert in_w == in_size and hid_w == hidden
    cdt = w1.dtype

    # ---- batch tile selection ----------------------------------------------
    # Multiple of 8 sublanes; minimize padding waste; grid >= 2 for largish B
    # so the "parallel" batch axis shards across both TCs on v7x.
    n_tiles = max(1, _cdiv(B, block_b))
    if n_tiles == 1 and B >= 256:
        n_tiles = 2
    tb = _round_up(_cdiv(B, n_tiles), 8)
    grid_b = _cdiv(B, tb)
    b_p = grid_b * tb

    # ---- x: cast to compute dtype, pad only the batch rows ------------------
    x_c = x.astype(cdt) if x.dtype != cdt else x
    if b_p != B:
        x_c = jnp.pad(x_c, ((0, b_p - B), (0, 0)))

    itemsize = jnp.dtype(cdt).itemsize
    cost = pl.CostEstimate(
        flops=2 * b_p * (in_size * hidden + hidden * out_size),
        transcendentals=0,
        bytes_accessed=(b_p * in_size * itemsize          # x streamed
                        + in_size * hidden * itemsize     # w1 once
                        + hidden * out_size * itemsize    # w2 once
                        + (hidden + out_size) * 4         # biases once
                        + b_p * out_size * 4),            # output streamed
    )

    out = pl.pallas_call(
        _mlp_kernel,
        out_shape=jax.ShapeDtypeStruct((b_p, out_size), jnp.float32),
        grid_spec=pltpu.PrefetchScalarGridSpec(
            num_scalar_prefetch=0,
            grid=(grid_b,),
            in_specs=[
                # batch-tiled x; last dim == full array dim (no feature padding)
                pl.BlockSpec((tb, in_size), lambda i: (i, 0)),
                # weights/biases: full-extent blocks, constant index_map ->
                # DMA'd once, VMEM-resident across the whole grid.
                pl.BlockSpec((in_size, hidden), lambda i: (0, 0)),
                pl.BlockSpec((1, hidden), lambda i: (0, 0)),
                pl.BlockSpec((hidden, out_size), lambda i: (0, 0)),
                pl.BlockSpec((1, out_size), lambda i: (0, 0)),
            ],
            # unpadded output block (full-dim last axis)
            out_specs=pl.BlockSpec((tb, out_size), lambda i: (i, 0)),
        ),
        compiler_params=pltpu.CompilerParams(
            # Independent batch tiles -> shard grid across TCs (v7x megacore).
            dimension_semantics=("parallel",),
        ),
        cost_estimate=cost,
    )(x_c, w1, b1, w2, b2)

    return out if b_p == B else out[:B]


def init_params(key, input_size, hidden_size, output_size):
    """Deterministic init mimicking nn.Linear's uniform(-1/sqrt(fan_in), +)."""
    k1, k2, k3, k4 = jax.random.split(key, 4)
    bound1 = 1.0 / jnp.sqrt(jnp.float32(input_size))
    bound2 = 1.0 / jnp.sqrt(jnp.float32(hidden_size))
    # Stored as [in, out] (i.e. PyTorch weight transposed).
    w1 = jax.random.uniform(k1, (input_size, hidden_size), jnp.float32, -bound1, bound1)
    b1 = jax.random.uniform(k2, (1, hidden_size), jnp.float32, -bound1, bound1)
    w2 = jax.random.uniform(k3, (hidden_size, output_size), jnp.float32, -bound2, bound2)
    b2 = jax.random.uniform(k4, (1, output_size), jnp.float32, -bound2, bound2)
    return w1, b1, w2, b2


if __name__ == "__main__":
    # Small shapes consistent with the module; batch > tile so the pipelined
    # grid (and the 2-TC split) is exercised.
    batch, input_size, hidden_size, output_size = 256, 16, 32, 8

    key = jax.random.PRNGKey(0)
    kx, kp = jax.random.split(key)
    x = jax.random.normal(kx, (batch, input_size), jnp.float32)
    w1, b1, w2, b2 = init_params(kp, input_size, hidden_size, output_size)

    ref = jnp.maximum(x @ w1 + b1, 0.0) @ w2 + b2

    # fp32 path (exact semantics of the PyTorch module).
    p32 = prepare_params(w1, b1, w2, b2, compute_dtype=jnp.float32)
    out = neural_network_forward(x, *p32, block_b=128)
    out = jax.block_until_ready(out)
    assert out.shape == (batch, output_size)
    assert jnp.allclose(out, ref, atol=1e-5), "fp32 mismatch vs reference"

    # bf16 compute path (f32 accumulation / bias / relu) — the default,
    # MXU-native on v5e/v6e/v7x.
    pbf = prepare_params(w1, b1, w2, b2, compute_dtype=jnp.bfloat16)
    out_bf16 = neural_network_forward(x, *pbf, block_b=128)
    out_bf16 = jax.block_until_ready(out_bf16)
    assert out_bf16.shape == (batch, output_size)
    assert jnp.allclose(out_bf16, ref, atol=5e-2, rtol=5e-2), "bf16 mismatch vs reference"

    print("KERNEL_OK")
</pallas_src>

<mosaic_0001>
module attributes {stable_mosaic.version = 11 : i64} {
  func.func @_mlp_kernel(%arg0: i32, %arg1: memref<128x16xf32, #tpu.memory_space<vmem>>, %arg2: memref<16x32xf32, #tpu.memory_space<vmem>>, %arg3: memref<1x32xf32, #tpu.memory_space<vmem>>, %arg4: memref<32x8xf32, #tpu.memory_space<vmem>>, %arg5: memref<1x8xf32, #tpu.memory_space<vmem>>, %arg6: memref<128x8xf32, #tpu.memory_space<vmem>>) attributes {dimension_semantics = [#tpu.dimension_semantics<parallel>], iteration_bounds = array<i64: 2>, scalar_prefetch = 0 : i64, scratch_operands = 0 : i64, tpu.core_type = #tpu.core_type<tc>, window_params = [{transform_indices = @transform_0, window_bounds = array<i64: 128, 16>}, {pipeline_mode = #tpu.pipeline_mode<synchronous>, transform_indices = @transform_1, window_bounds = array<i64: 16, 32>}, {pipeline_mode = #tpu.pipeline_mode<synchronous>, transform_indices = @transform_2, window_bounds = array<i64: 1, 32>}, {pipeline_mode = #tpu.pipeline_mode<synchronous>, transform_indices = @transform_3, window_bounds = array<i64: 32, 8>}, {pipeline_mode = #tpu.pipeline_mode<synchronous>, transform_indices = @transform_4, window_bounds = array<i64: 1, 8>}, {transform_indices = @transform_5, window_bounds = array<i64: 128, 8>}]} {
    %c0 = arith.constant 0 : index
    %c0_0 = arith.constant 0 : index
    %0 = vector.load %arg1[%c0, %c0_0] : memref<128x16xf32, #tpu.memory_space<vmem>>, vector<128x16xf32>
    %c0_1 = arith.constant 0 : index
    %c0_2 = arith.constant 0 : index
    %1 = vector.load %arg2[%c0_1, %c0_2] : memref<16x32xf32, #tpu.memory_space<vmem>>, vector<16x32xf32>
    %cst = arith.constant dense<0.000000e+00> : vector<128x32xf32>
    %2 = tpu.matmul %0, %1, %cst {dimension_numbers = #tpu.dot_dimension_numbers<[1], [0], [0], [1], [0, 0, 1, 1], [], []>} : vector<128x16xf32>, vector<16x32xf32>, vector<128x32xf32> -> vector<128x32xf32>
    %c0_3 = arith.constant 0 : index
    %c0_4 = arith.constant 0 : index
    %3 = vector.load %arg3[%c0_3, %c0_4] : memref<1x32xf32, #tpu.memory_space<vmem>>, vector<1x32xf32>
    %4 = vector.broadcast %3 : vector<1x32xf32> to vector<128x32xf32>
    %5 = arith.addf %2, %4 : vector<128x32xf32>
    %cst_5 = arith.constant 0.000000e+00 : f32
    %6 = vector.broadcast %cst_5 : f32 to vector<128x32xf32>
    %7 = arith.maximumf %5, %6 : vector<128x32xf32>
    %c0_6 = arith.constant 0 : index
    %c0_7 = arith.constant 0 : index
    %8 = vector.load %arg4[%c0_6, %c0_7] : memref<32x8xf32, #tpu.memory_space<vmem>>, vector<32x8xf32>
    %cst_8 = arith.constant dense<0.000000e+00> : vector<128x8xf32>
    %9 = tpu.matmul %7, %8, %cst_8 {dimension_numbers = #tpu.dot_dimension_numbers<[1], [0], [0], [1], [0, 0, 1, 1], [], []>} : vector<128x32xf32>, vector<32x8xf32>, vector<128x8xf32> -> vector<128x8xf32>
    %c0_9 = arith.constant 0 : index
    %c0_10 = arith.constant 0 : index
    %10 = vector.load %arg5[%c0_9, %c0_10] : memref<1x8xf32, #tpu.memory_space<vmem>>, vector<1x8xf32>
    %11 = vector.broadcast %10 : vector<1x8xf32> to vector<128x8xf32>
    %12 = arith.addf %9, %11 : vector<128x8xf32>
    %c0_11 = arith.constant 0 : index
    %c0_12 = arith.constant 0 : index
    %13 = vector.load %arg6[%c0_11, %c0_12] : memref<128x8xf32, #tpu.memory_space<vmem>>, vector<128x8xf32>
    tpu.vector_store %arg6[%c0_11, %c0_12], %12 {strides = array<i32>} : memref<128x8xf32, #tpu.memory_space<vmem>>, vector<128x8xf32>,
    return
  }
  func.func @transform_0(%arg0: i32) -> (i32, i32) {
    %c0_i32 = arith.constant 0 : i32
    %c0_i32_0 = arith.constant 0 : i32
    return %arg0, %c0_i32 : i32, i32
  }
  func.func @transform_1(%arg0: i32) -> (i32, i32) {
    %c0_i32 = arith.constant 0 : i32
    %c0_i32_0 = arith.constant 0 : i32
    %c0_i32_1 = arith.constant 0 : i32
    return %c0_i32, %c0_i32_0 : i32, i32
  }
  func.func @transform_2(%arg0: i32) -> (i32, i32) {
    %c0_i32 = arith.constant 0 : i32
    %c0_i32_0 = arith.constant 0 : i32
    %c0_i32_1 = arith.constant 0 : i32
    return %c0_i32, %c0_i32_0 : i32, i32
  }
  func.func @transform_3(%arg0: i32) -> (i32, i32) {
    %c0_i32 = arith.constant 0 : i32
    %c0_i32_0 = arith.constant 0 : i32
    %c0_i32_1 = arith.constant 0 : i32
    return %c0_i32, %c0_i32_0 : i32, i32
  }
  func.func @transform_4(%arg0: i32) -> (i32, i32) {
    %c0_i32 = arith.constant 0 : i32
    %c0_i32_0 = arith.constant 0 : i32
    %c0_i32_1 = arith.constant 0 : i32
    return %c0_i32, %c0_i32_0 : i32, i32
  }
  func.func @transform_5(%arg0: i32) -> (i32, i32) {
    %c0_i32 = arith.constant 0 : i32
    %c0_i32_0 = arith.constant 0 : i32
    return %arg0, %c0_i32 : i32, i32
  }
}

</mosaic_0001>

<bundles_post_ra>
// kernel: tpu_custom_call.1
= control target key start
LH: loop header
LB: loop body
LE: loop exit
PB: predicated region body
PF: predicated region fallthrough
CT: control target
= control target key end

     0   :  { %s942_s18 = smov 0   ;;  %s1074_s0 = inlined_call_operand.vmem [shape: f32[256,16], index: 0, kind: input, shape index: {}]   ;;  %s1075_s1 = inlined_call_operand.vmem [shape: f32[16,32], index: 1, kind: input, shape index: {}]   ;;  %s1076_s2 = inlined_call_operand.vmem [shape: f32[1,32], index: 2, kind: input, shape index: {}]   ;;  %s1077_s3 = inlined_call_operand.vmem [shape: f32[32,8], index: 3, kind: input, shape index: {}]   ;;  %s1078_s4 = inlined_call_operand.vmem [shape: f32[1,8], index: 4, kind: input, shape index: {}]   ;;  %s1079_s5 = inlined_call_operand.vmem [shape: f32[256,8], index: 5, kind: output, shape index: {}]  }
   0x1 LB: > { %s741_s19 = sadd.s32 4294967295, %s910_s18   ;;  %p745_p0 = scmp.ge.s32.totalorder %s910_s18, 1  ;;  %s910_s18 = sphi %s942_s18, %s15_s18  }
   0x2   : > { %p188_p1 = scmp.lt.s32.totalorder %s910_s18, 3 }
   0x4   : > { %p189_p2 = pnand %p745_p0, %p188_p1 }
   0x5   : > { %v244_v0 = vld [vmem:[%s1075_s1] sm:$0xff] (!%p189_p2)  ;;  %v245_v1 = vld [vmem:[%s1075_s1 + $0x8] sm:$0xff] (!%p189_p2)  ;;  %s746_s24 = sshll.u32 (!%p189_p2), %s741_s19, 4  ;;  %vm253_vm0 = vcmask (!%p189_p2), 130048   ;;  %v465_v22 = vld [vmem:[%s1077_s3 + $0x10] sm:$0xff] (!%p189_p2)  ;;  %vm474_vm1 = vcmask (!%p189_p2), 261120  }
   0x6   : > { %192 = sbr.rel (%p189_p2) target bundleno = 480 (0x1e0), region = 40  ;;  %v463_v2 = vld [vmem:[%s1077_s3] sm:$0xff] (!%p189_p2)  ;;  %v884_v3 = vpack.c.bf16 (!%p189_p2), %v245_v1, %v244_v0  ;;  %p217_p3 = scmp.lt.s32.totalorder (!%p189_p2), %s746_s24, 31  ;;  %v464_v4 = vld [vmem:[%s1077_s3 + $0x8] sm:$0xff] (!%p189_p2)  ;;  %v466_v23 = vld [vmem:[%s1077_s3 + $0x18] sm:$0xff] (!%p189_p2)  ;;  %vm668_vm2 = vcmask (!%p189_p2), 64512  }
   0x7   : > { %v888_v5 = vpack.c.bf16 (!%p189_p2), %v464_v4, %v463_v2  ;;  %v892_v24 = vpack.c.bf16 (!%p189_p2), %v466_v23, %v465_v22  ;;  %v750_v25 = vld [vmem:[%s1076_s2] ss:$0 sm:$0xff] (!%p189_p2) }
   0x8   : > { %885 = vmatprep.subr.bf16.mxu0 (!%p189_p2), %v884_v3 }
   0x9   : > { %887 = vmatpush3.bf16.msra.mxu0 (!%p189_p2), %v884_v3  ;;  %889 = vmatprep.subr.bf16.mxu1 (!%p189_p2), %v888_v5 }
   0xa   : > { %891 = vmatpush3.bf16.msra.mxu1 (!%p189_p2), %v888_v5 }
   0xb   : > { %893 = vmatprep.subr.bf16.mxu1 (!%p189_p2), %v892_v24 }
   0xd   : > { %s1081_s24 = smov (!%p217_p3, %s746_s24), 31 }
   0xe   : > { %s747_s29 = sshll.u32 %s1081_s24, 3  ;;  %895 = vmatpush3.bf16.msra.mxu1 %v892_v24 }
   0xf   : > { %s970_s7 = scalar_lea.vmem %s1074_s0, %s747_s29  ;;  %s1037_s19 = scalar_lea.vmem %s1079_s5, %s747_s29 }
  0x10   : > { %v228_v6 = vld [vmem:[%s970_s7] sm:$0xff]  ;;  %v229_v7 = vld [vmem:[%s970_s7 + $0x8] sm:$0xff]  ;;  %v230_v8 = vld [vmem:[%s970_s7 + $0x10] sm:$0xff] }
  0x11   : > { %828 = vmatprep.mubr.msk.f32.mxu0 %vm253_vm0, %v228_v6  ;;  %v231_v9 = vld [vmem:[%s970_s7 + $0x18] sm:$0xff]  ;;  %v232_v10 = vld [vmem:[%s970_s7 + $0x20] sm:$0xff]  ;;  %v233_v11 = vld [vmem:[%s970_s7 + $0x28] sm:$0xff] }
  0x12   : > { %829 = vmatmul.mubr.msk.f32.vlgmr.msra.gmra.mrb[0].mxu0 %vm253_vm0, %v229_v7  ;;  %v234_v12 = vld [vmem:[%s970_s7 + $0x30] sm:$0xff]  ;;  %v235_v13 = vld [vmem:[%s970_s7 + $0x38] sm:$0xff]  ;;  %v236_v14 = vld [vmem:[%s970_s7 + $0x40] sm:$0xff] }
  0x13   : > { %831 = vmatprep.mubr.msk.f32.mxu0 %vm253_vm0, %v230_v8  ;;  %v237_v15 = vld [vmem:[%s970_s7 + $0x48] sm:$0xff]  ;;  %v238_v16 = vld [vmem:[%s970_s7 + $0x50] sm:$0xff]  ;;  %v239_v17 = vld [vmem:[%s970_s7 + $0x58] sm:$0xff] }
  0x14   : > { %v240_v18 = vld [vmem:[%s970_s7 + $0x60] sm:$0xff]  ;;  %v241_v19 = vld [vmem:[%s970_s7 + $0x68] sm:$0xff]  ;;  %v242_v20 = vld [vmem:[%s970_s7 + $0x70] sm:$0xff] }
  0x15   : > { %v243_v21 = vld [vmem:[%s970_s7 + $0x78] sm:$0xff] }
  0x16   : > { %832 = vmatmul.mubr.msk.f32.gmra.mrb[2].mxu0 %vm253_vm0, %v231_v9 }
  0x17   : > { %834 = vmatprep.mubr.msk.f32.mxu0 %vm253_vm0, %v232_v10  ;;  %v767_v10 = vld [vmem:[%s1078_s4] ss:$0 sm:$0xff] }
  0x1a   : > { %835 = vmatmul.mubr.msk.f32.gmra.mrb[4].mxu0 %vm253_vm0, %v233_v11 }
  0x1b   : > { %837 = vmatprep.mubr.msk.f32.mxu0 %vm253_vm0, %v234_v12 }
  0x1e   : > { %838 = vmatmul.mubr.msk.f32.gmra.mrb[6].mxu0 %vm253_vm0, %v235_v13 }
  0x1f   : > { %840 = vmatprep.mubr.msk.f32.mxu0 %vm253_vm0, %v236_v14 }
  0x22   : > { %841 = vmatmul.mubr.msk.f32.gmra.mrb[8].mxu0 %vm253_vm0, %v237_v15 }
  0x23   : > { %843 = vmatprep.mubr.msk.f32.mxu0 %vm253_vm0, %v238_v16 }
  0x26   : > { %844 = vmatmul.mubr.msk.f32.gmra.mrb[10].mxu0 %vm253_vm0, %v239_v17 }
  0x27   : > { %846 = vmatprep.mubr.msk.f32.mxu0 %vm253_vm0, %v240_v18 }
  0x2a   : > { %847 = vmatmul.mubr.msk.f32.gmra.mrb[12].mxu0 %vm253_vm0, %v241_v19 }
  0x2b   : > { %849 = vmatprep.mubr.msk.f32.mxu0 %vm253_vm0, %v242_v20 }
  0x2e   : > { %850 = vmatmul.mubr.msk.f32.gmra.mrb[14].mxu0 %vm253_vm0, %v243_v21 }
  0xe5   : > { %v830_v26 = vpop.f32.mrb[0].mxu0 }
  0xe6   : > { %v374_v27 = vadd.f32 %v830_v26, %v750_v25  ;;  %v368_v28 = vpop.f32.mrb[1].mxu0 }
  0xe7   : > { %v369_v29 = vadd.f32 %v750_v25, %v368_v28 }
  0xe8   : > { %v448_v32 = vmax.f32 %v374_v27, 0.0 }
  0xe9   : > { %v447_v30 = vmax.f32 %v369_v29, 0.0  ;;  %v833_v31 = vpop.f32.mrb[2].mxu0 }
  0xea   : > { %v384_v33 = vadd.f32 %v833_v31, %v750_v25  ;;  %v378_v34 = vpop.f32.mrb[3].mxu0 }
  0xeb   : > { %v379_v35 = vadd.f32 %v750_v25, %v378_v34  ;;  %860 = vmatprep.mubr.msk.f32.mxu1 %vm474_vm1, %v447_v30 }
  0xec   : > { %861 = vmatmul.mubr.msk.f32.vlgmr.msra.gmra.mrb[0].mxu1 %vm474_vm1, %v448_v32  ;;  %v450_v38 = vmax.f32 %v384_v33, 0.0 }
  0xed   : > { %v449_v36 = vmax.f32 %v379_v35, 0.0  ;;  %v836_v37 = vpop.f32.mrb[4].mxu0 }
  0xee   : > { %v394_v39 = vadd.f32 %v836_v37, %v750_v25  ;;  %v388_v40 = vpop.f32.mrb[5].mxu0 }
  0xef   : > { %v389_v41 = vadd.f32 %v750_v25, %v388_v40  ;;  %863 = vmatprep.mubr.msk.f32.mxu1 %vm474_vm1, %v449_v36 }
  0xf0   : > { %864 = vmatmul.mubr.msk.f32.gmra.mrb[2].mxu1 %vm474_vm1, %v450_v38  ;;  %v452_v44 = vmax.f32 %v394_v39, 0.0 }
  0xf1   : > { %v451_v42 = vmax.f32 %v389_v41, 0.0  ;;  %v839_v43 = vpop.f32.mrb[6].mxu0 }
  0xf2   : > { %v404_v45 = vadd.f32 %v839_v43, %v750_v25  ;;  %v398_v46 = vpop.f32.mrb[7].mxu0 }
  0xf3   : > { %v399_v47 = vadd.f32 %v750_v25, %v398_v46  ;;  %866 = vmatprep.mubr.msk.f32.mxu1 %vm474_vm1, %v451_v42 }
  0xf4   : > { %867 = vmatmul.mubr.msk.f32.gmra.mrb[4].mxu1 %vm474_vm1, %v452_v44  ;;  %v454_v50 = vmax.f32 %v404_v45, 0.0 }
  0xf5   : > { %v453_v48 = vmax.f32 %v399_v47, 0.0  ;;  %v842_v49 = vpop.f32.mrb[8].mxu0 }
  0xf6   : > { %v414_v51 = vadd.f32 %v842_v49, %v750_v25  ;;  %v408_v52 = vpop.f32.mrb[9].mxu0 }
  0xf7   : > { %v409_v53 = vadd.f32 %v750_v25, %v408_v52  ;;  %869 = vmatprep.mubr.msk.f32.mxu1 %vm474_vm1, %v453_v48 }
  0xf8   : > { %870 = vmatmul.mubr.msk.f32.gmra.mrb[6].mxu1 %vm474_vm1, %v454_v50  ;;  %v456_v56 = vmax.f32 %v414_v51, 0.0 }
  0xf9   : > { %v455_v54 = vmax.f32 %v409_v53, 0.0  ;;  %v845_v55 = vpop.f32.mrb[10].mxu0 }
  0xfa   : > { %v424_v57 = vadd.f32 %v845_v55, %v750_v25  ;;  %v418_v58 = vpop.f32.mrb[11].mxu0 }
  0xfb   : > { %v419_v59 = vadd.f32 %v750_v25, %v418_v58  ;;  %872 = vmatprep.mubr.msk.f32.mxu1 %vm474_vm1, %v455_v54 }
  0xfc   : > { %873 = vmatmul.mubr.msk.f32.gmra.mrb[8].mxu1 %vm474_vm1, %v456_v56  ;;  %v458_v62 = vmax.f32 %v424_v57, 0.0 }
  0xfd   : > { %v457_v60 = vmax.f32 %v419_v59, 0.0  ;;  %v848_v61 = vpop.f32.mrb[12].mxu0 }
  0xfe   : > { %v434_v63 = vadd.f32 %v848_v61, %v750_v25  ;;  %v428_v0 = vpop.f32.mrb[13].mxu0 }
  0xff   : > { %v429_v1 = vadd.f32 %v750_v25, %v428_v0  ;;  %875 = vmatprep.mubr.msk.f32.mxu1 %vm474_vm1, %v457_v60 }
 0x100   : > { %876 = vmatmul.mubr.msk.f32.gmra.mrb[10].mxu1 %vm474_vm1, %v458_v62  ;;  %v460_v4 = vmax.f32 %v434_v63, 0.0 }
 0x101   : > { %v459_v2 = vmax.f32 %v429_v1, 0.0  ;;  %v851_v3 = vpop.f32.mrb[14].mxu0 }
 0x102   : > { %v444_v5 = vadd.f32 %v851_v3, %v750_v25  ;;  %v438_v6 = vpop.f32.mrb[15].mxu0 }
 0x103   : > { %v439_v7 = vadd.f32 %v750_v25, %v438_v6  ;;  %878 = vmatprep.mubr.msk.f32.mxu1 %vm474_vm1, %v459_v2 }
 0x104   : > { %879 = vmatmul.mubr.msk.f32.gmra.mrb[12].mxu1 %vm474_vm1, %v460_v4  ;;  %v462_v9 = vmax.f32 %v444_v5, 0.0 }
 0x105   : > { %v461_v8 = vmax.f32 %v439_v7, 0.0 }
 0x107   : > { %881 = vmatprep.mubr.msk.f32.mxu1 %vm474_vm1, %v461_v8 }
 0x108   : > { %882 = vmatmul.mubr.msk.f32.gmra.mrb[14].mxu1 %vm474_vm1, %v462_v9 }
 0x1bf   : > { %v862_v11 = vpop.f32.mrb[0].mxu1 }
 0x1c0   : > { %v595_v12 = vadd.f32 %v862_v11, %v767_v10  ;;  %v589_v13 = vpop.f32.mrb[1].mxu1 }
 0x1c1   : > { %v590_v14 = vadd.f32 %v767_v10, %v589_v13 }
 0x1c2   : > { %670 = vst.msk [vmem:[%s1037_s19 + $0x8] sm:$0xff] %vm668_vm2, %v595_v12 }
 0x1c3   : > { %669 = vst.msk [vmem:[%s1037_s19] sm:$0xff] %vm668_vm2, %v590_v14  ;;  %v865_v15 = vpop.f32.mrb[2].mxu1 }
 0x1c4   : > { %v605_v16 = vadd.f32 %v865_v15, %v767_v10  ;;  %v599_v17 = vpop.f32.mrb[3].mxu1 }
 0x1c5   : > { %v600_v18 = vadd.f32 %v767_v10, %v599_v17 }
 0x1c6   : > { %672 = vst.msk [vmem:[%s1037_s19 + $0x18] sm:$0xff] %vm668_vm2, %v605_v16 }
 0x1c7   : > { %671 = vst.msk [vmem:[%s1037_s19 + $0x10] sm:$0xff] %vm668_vm2, %v600_v18  ;;  %v868_v19 = vpop.f32.mrb[4].mxu1 }
 0x1c8   : > { %v615_v20 = vadd.f32 %v868_v19, %v767_v10  ;;  %v609_v21 = vpop.f32.mrb[5].mxu1 }
 0x1c9   : > { %v610_v22 = vadd.f32 %v767_v10, %v609_v21 }
 0x1ca   : > { %674 = vst.msk [vmem:[%s1037_s19 + $0x28] sm:$0xff] %vm668_vm2, %v615_v20 }
 0x1cb   : > { %673 = vst.msk [vmem:[%s1037_s19 + $0x20] sm:$0xff] %vm668_vm2, %v610_v22  ;;  %v871_v23 = vpop.f32.mrb[6].mxu1 }
 0x1cc   : > { %v625_v24 = vadd.f32 %v871_v23, %v767_v10  ;;  %v619_v25 = vpop.f32.mrb[7].mxu1 }
 0x1cd   : > { %v620_v26 = vadd.f32 %v767_v10, %v619_v25 }
 0x1ce   : > { %676 = vst.msk [vmem:[%s1037_s19 + $0x38] sm:$0xff] %vm668_vm2, %v625_v24 }
 0x1cf   : > { %675 = vst.msk [vmem:[%s1037_s19 + $0x30] sm:$0xff] %vm668_vm2, %v620_v26  ;;  %v874_v27 = vpop.f32.mrb[8].mxu1 }
 0x1d0   : > { %v635_v28 = vadd.f32 %v874_v27, %v767_v10  ;;  %v629_v29 = vpop.f32.mrb[9].mxu1 }
 0x1d1   : > { %v630_v30 = vadd.f32 %v767_v10, %v629_v29 }
 0x1d2   : > { %678 = vst.msk [vmem:[%s1037_s19 + $0x48] sm:$0xff] %vm668_vm2, %v635_v28 }
 0x1d3   : > { %677 = vst.msk [vmem:[%s1037_s19 + $0x40] sm:$0xff] %vm668_vm2, %v630_v30  ;;  %v877_v31 = vpop.f32.mrb[10].mxu1 }
 0x1d4   : > { %v645_v32 = vadd.f32 %v877_v31, %v767_v10  ;;  %v639_v33 = vpop.f32.mrb[11].mxu1 }
 0x1d5   : > { %v640_v34 = vadd.f32 %v767_v10, %v639_v33 }
 0x1d6   : > { %680 = vst.msk [vmem:[%s1037_s19 + $0x58] sm:$0xff] %vm668_vm2, %v645_v32 }
 0x1d7   : > { %679 = vst.msk [vmem:[%s1037_s19 + $0x50] sm:$0xff] %vm668_vm2, %v640_v34  ;;  %v880_v35 = vpop.f32.mrb[12].mxu1 }
 0x1d8   : > { %v655_v36 = vadd.f32 %v880_v35, %v767_v10  ;;  %v649_v37 = vpop.f32.mrb[13].mxu1 }
 0x1d9   : > { %v650_v38 = vadd.f32 %v767_v10, %v649_v37 }
 0x1da   : > { %682 = vst.msk [vmem:[%s1037_s19 + $0x68] sm:$0xff] %vm668_vm2, %v655_v36 }
 0x1db   : > { %681 = vst.msk [vmem:[%s1037_s19 + $0x60] sm:$0xff] %vm668_vm2, %v650_v38  ;;  %v883_v39 = vpop.f32.mrb[14].mxu1 }
 0x1dc   : > { %v665_v40 = vadd.f32 %v883_v39, %v767_v10  ;;  %v659_v41 = vpop.f32.mrb[15].mxu1 }
 0x1dd   : > { %v660_v42 = vadd.f32 %v767_v10, %v659_v41 }
 0x1de   : > { %684 = vst.msk [vmem:[%s1037_s19 + $0x78] sm:$0xff] %vm668_vm2, %v665_v40 }
 0x1df   : > { %683 = vst.msk [vmem:[%s1037_s19 + $0x70] sm:$0xff] %vm668_vm2, %v660_v42 }
 0x1e0 PF: > { %s15_s18 = sadd.s32 1, %s910_s18  }
 0x1e1   : > { %p12_p4 = scmp.ge.s32.totalorder %s15_s18, 4  }
 0x1e3   :  { %14 = sbr.rel (!%p12_p4) target bundleno = 1 (0x1), region = 70 }

</bundles_post_ra>
